<compile_context>
chip_gen: v6e
topology: v6e:2x2x1
jax: 0.10.0
libtpu: 0.0.40
codegen_flags: <defaults>
</compile_context>

<pallas_src>
import jax
import jax.numpy as jnp
from jax.experimental import pallas as pl
from jax.experimental.pallas import tpu as pltpu

NSTATE = 8
S1 = 100
S2 = 50
CLASSES = 4
NEG_SLOPE = 0.05

PAD = 128      # lane width for hidden feature dims
CLS_PAD = 8    # output class lanes (4 real + 4 zero)


def _leaky_relu(x, slope):
    # Equivalent to where(x >= 0, x, slope*x) for 0 < slope < 1.
    return jnp.maximum(x, slope * x)


def _cdiv(a, b):
    return (a + b - 1) // b


def _round_up(n, m):
    return _cdiv(n, m) * m


def _choose_tiling(B):
    """Pick (tile_rows, num_tiles): >=2 tiles once B > 512 (v7x megacore),
    tiles up to 2048 rows for large B (per-step overhead), small overshoot."""
    MAX_TB = 2048
    if B <= 512:
        ntiles = 1
    else:
        ntiles = max(2, _cdiv(B, MAX_TB))
    tb = _round_up(_cdiv(B, ntiles), 8)
    ntiles = _cdiv(B, tb)
    return tb, ntiles


def diayn_kernel(x_ref, w1_ref, b1_ref, w2_ref, b2_ref, w3_ref, b3_ref, out_ref):
    # One batch tile per grid step; weights/biases resident in VMEM.
    x = x_ref[...].astype(jnp.bfloat16)                                     # (TB, 8)

    h1 = jnp.dot(x, w1_ref[...], preferred_element_type=jnp.float32) + b1_ref[...]
    h1 = _leaky_relu(h1, NEG_SLOPE)                                         # (TB, 128) f32

    h2 = jnp.dot(h1.astype(jnp.bfloat16), w2_ref[...],
                 preferred_element_type=jnp.float32) + b2_ref[...]
    h2 = _leaky_relu(h2, NEG_SLOPE)                                         # (TB, 128) f32

    logits = jnp.dot(h2.astype(jnp.bfloat16), w3_ref[...],
                     preferred_element_type=jnp.float32) + b3_ref[...]      # (TB, 128)

    # Mask padded class lanes (>= CLASSES); exp underflows them to exactly 0.
    lane = jax.lax.broadcasted_iota(jnp.int32, logits.shape, 1)
    logits = jnp.where(lane < CLASSES, logits, jnp.float32(-1e30))

    # Numerically stable softmax over the class axis.
    m = jnp.max(logits, axis=-1, keepdims=True)
    e = jnp.exp(logits - m)
    denom = jnp.sum(e, axis=-1, keepdims=True)
    r = pl.reciprocal(denom, approx=True)
    r = r * (2.0 - denom * r)          # one Newton step -> ~full f32 accuracy

    # Store only the first CLS_PAD lanes (4 real classes + 4 exact zeros).
    out_ref[...] = e[:, :CLS_PAD] * r


def prepare_params(params):
    """One-time: pad to lane-dense layouts and cast weights to bf16."""
    w1, b1, w2, b2, w3, b3 = params
    w1_p = jnp.zeros((NSTATE, PAD), jnp.bfloat16).at[:, :S1].set(w1.astype(jnp.bfloat16))
    b1_p = jnp.zeros((1, PAD), jnp.float32).at[:, :S1].set(b1)
    w2_p = jnp.zeros((PAD, PAD), jnp.bfloat16).at[:S1, :S2].set(w2.astype(jnp.bfloat16))
    b2_p = jnp.zeros((1, PAD), jnp.float32).at[:, :S2].set(b2)
    w3_p = jnp.zeros((PAD, PAD), jnp.bfloat16).at[:S2, :CLASSES].set(w3.astype(jnp.bfloat16))
    b3_p = jnp.zeros((1, PAD), jnp.float32).at[:, :CLASSES].set(b3)
    return (w1_p, b1_p, w2_p, b2_p, w3_p, b3_p)


def diayn_forward(x, prepped_params):
    """x: (B, NSTATE) f32 -> softmax probabilities (B, CLASSES) f32."""
    w1, b1, w2, b2, w3, b3 = prepped_params
    B = x.shape[0]
    tb, ntiles = _choose_tiling(B)
    b_pad = tb * ntiles

    x = x.astype(jnp.float32)
    if b_pad != B:
        x = jnp.pad(x, ((0, b_pad - B), (0, 0)))     # rows only; stays 8 lanes wide

    const = lambda i: (0, 0)   # weights/biases: same block every step (VMEM-resident)

    out = pl.pallas_call(
        diayn_kernel,
        out_shape=jax.ShapeDtypeStruct((b_pad, CLS_PAD), jnp.float32),
        grid_spec=pltpu.PrefetchScalarGridSpec(
            num_scalar_prefetch=0,
            grid=(ntiles,),
            in_specs=[
                pl.BlockSpec((tb, NSTATE), lambda i: (i, 0)),   # x tile (8 lanes)
                pl.BlockSpec((NSTATE, PAD), const),             # W1 (8, 128) bf16
                pl.BlockSpec((1, PAD), const),                  # b1
                pl.BlockSpec((PAD, PAD), const),                # W2 bf16
                pl.BlockSpec((1, PAD), const),                  # b2
                pl.BlockSpec((PAD, PAD), const),                # W3 bf16
                pl.BlockSpec((1, PAD), const),                  # b3
            ],
            out_specs=pl.BlockSpec((tb, CLS_PAD), lambda i: (i, 0)),
        ),
        compiler_params=pltpu.CompilerParams(
            dimension_semantics=("parallel",),   # megacore sharding on v7x
        ),
    )(x, w1, b1, w2, b2, w3, b3)

    return out[:B, :CLASSES]


def init_params(key):
    """Deterministic init mimicking PyTorch nn.Linear default (U[-1/sqrt(fan_in), +])."""
    ks = jax.random.split(key, 6)

    def linear(kw, kb, fan_in, fan_out):
        bound = 1.0 / jnp.sqrt(jnp.float32(fan_in))
        w = jax.random.uniform(kw, (fan_in, fan_out), jnp.float32, -bound, bound)
        b = jax.random.uniform(kb, (1, fan_out), jnp.float32, -bound, bound)
        return w, b

    w1, b1 = linear(ks[0], ks[1], NSTATE, S1)
    w2, b2 = linear(ks[2], ks[3], S1, S2)
    w3, b3 = linear(ks[4], ks[5], S2, CLASSES)
    return (w1, b1, w2, b2, w3, b3)


def diayn_reference(x, params, matmul_dtype=jnp.float32):
    """Pure-JAX reference (optionally mirroring the kernel's bf16 matmuls)."""
    w1, b1, w2, b2, w3, b3 = params

    def lin(h, w, b):
        return jnp.dot(h.astype(matmul_dtype), w.astype(matmul_dtype),
                       preferred_element_type=jnp.float32) + b

    h1 = _leaky_relu(lin(x, w1, b1), NEG_SLOPE)
    h2 = _leaky_relu(lin(h1, w2, b2), NEG_SLOPE)
    logits = lin(h2, w3, b3)
    return jax.nn.softmax(logits, axis=-1)


# TODO(synk): training step (CrossEntropyLoss + Adam/RMSprop), save/load are
# host-side / optimizer-state machinery, not part of the forward kernel.

if __name__ == "__main__":
    key = jax.random.PRNGKey(0)
    k_param, k_x = jax.random.split(key)

    params = init_params(k_param)
    prepped = prepare_params(params)

    batch = 8
    x = jax.random.normal(k_x, (batch, NSTATE), dtype=jnp.float32)

    fwd = jax.jit(diayn_forward)
    out = jax.block_until_ready(fwd(x, prepped))

    ref_bf16 = diayn_reference(x, params, matmul_dtype=jnp.bfloat16)  # mirrors kernel math
    ref_f32 = diayn_reference(x, params, matmul_dtype=jnp.float32)    # original f32 module

    assert out.shape == (batch, CLASSES)
    assert jnp.allclose(out, ref_bf16, atol=1e-4, rtol=1e-3), "mismatch vs bf16 reference"
    assert jnp.allclose(out, ref_f32, atol=5e-2), "mismatch vs f32 reference"
    # Softmax rows sum to 1.
    assert jnp.allclose(jnp.sum(out, axis=-1), jnp.ones((batch,)), atol=1e-4)

    print("KERNEL_OK")
</pallas_src>

<mosaic_0001>
module attributes {stable_mosaic.version = 11 : i64} {
  func.func @diayn_kernel(%arg0: i32, %arg1: memref<8x8xf32, #tpu.memory_space<vmem>>, %arg2: memref<8x128xbf16, #tpu.memory_space<vmem>>, %arg3: memref<1x128xf32, #tpu.memory_space<vmem>>, %arg4: memref<128x128xbf16, #tpu.memory_space<vmem>>, %arg5: memref<1x128xf32, #tpu.memory_space<vmem>>, %arg6: memref<128x128xbf16, #tpu.memory_space<vmem>>, %arg7: memref<1x128xf32, #tpu.memory_space<vmem>>, %arg8: memref<8x8xf32, #tpu.memory_space<vmem>>) attributes {dimension_semantics = [#tpu.dimension_semantics<parallel>], iteration_bounds = array<i64: 1>, scalar_prefetch = 0 : i64, scratch_operands = 0 : i64, tpu.core_type = #tpu.core_type<tc>, window_params = [{transform_indices = @transform_0, window_bounds = array<i64: 8, 8>}, {pipeline_mode = #tpu.pipeline_mode<synchronous>, transform_indices = @transform_1, window_bounds = array<i64: 8, 128>}, {pipeline_mode = #tpu.pipeline_mode<synchronous>, transform_indices = @transform_2, window_bounds = array<i64: 1, 128>}, {pipeline_mode = #tpu.pipeline_mode<synchronous>, transform_indices = @transform_3, window_bounds = array<i64: 128, 128>}, {pipeline_mode = #tpu.pipeline_mode<synchronous>, transform_indices = @transform_4, window_bounds = array<i64: 1, 128>}, {pipeline_mode = #tpu.pipeline_mode<synchronous>, transform_indices = @transform_5, window_bounds = array<i64: 128, 128>}, {pipeline_mode = #tpu.pipeline_mode<synchronous>, transform_indices = @transform_6, window_bounds = array<i64: 1, 128>}, {transform_indices = @transform_7, window_bounds = array<i64: 8, 8>}]} {
    %c0 = arith.constant 0 : index
    %c0_0 = arith.constant 0 : index
    %0 = vector.load %arg1[%c0, %c0_0] : memref<8x8xf32, #tpu.memory_space<vmem>>, vector<8x8xf32>
    %1 = arith.truncf %0 : vector<8x8xf32> to vector<8x8xbf16>
    %c0_1 = arith.constant 0 : index
    %c0_2 = arith.constant 0 : index
    %2 = vector.load %arg2[%c0_1, %c0_2] : memref<8x128xbf16, #tpu.memory_space<vmem>>, vector<8x128xbf16>
    %cst = arith.constant dense<0.000000e+00> : vector<8x128xf32>
    %3 = tpu.matmul %1, %2, %cst {dimension_numbers = #tpu.dot_dimension_numbers<[1], [0], [0], [1], [0, 0, 1, 1], [], []>} : vector<8x8xbf16>, vector<8x128xbf16>, vector<8x128xf32> -> vector<8x128xf32>
    %c0_3 = arith.constant 0 : index
    %c0_4 = arith.constant 0 : index
    %4 = vector.load %arg3[%c0_3, %c0_4] : memref<1x128xf32, #tpu.memory_space<vmem>>, vector<1x128xf32>
    %5 = vector.broadcast %4 : vector<1x128xf32> to vector<8x128xf32>
    %6 = arith.addf %3, %5 : vector<8x128xf32>
    %cst_5 = arith.constant 5.000000e-02 : f32
    %7 = vector.broadcast %cst_5 : f32 to vector<8x128xf32>
    %8 = arith.mulf %7, %6 : vector<8x128xf32>
    %9 = arith.maximumf %6, %8 : vector<8x128xf32>
    %10 = arith.truncf %9 : vector<8x128xf32> to vector<8x128xbf16>
    %c0_6 = arith.constant 0 : index
    %c0_7 = arith.constant 0 : index
    %11 = vector.load %arg4[%c0_6, %c0_7] : memref<128x128xbf16, #tpu.memory_space<vmem>>, vector<128x128xbf16>
    %cst_8 = arith.constant dense<0.000000e+00> : vector<8x128xf32>
    %12 = tpu.matmul %10, %11, %cst_8 {dimension_numbers = #tpu.dot_dimension_numbers<[1], [0], [0], [1], [0, 0, 1, 1], [], []>} : vector<8x128xbf16>, vector<128x128xbf16>, vector<8x128xf32> -> vector<8x128xf32>
    %c0_9 = arith.constant 0 : index
    %c0_10 = arith.constant 0 : index
    %13 = vector.load %arg5[%c0_9, %c0_10] : memref<1x128xf32, #tpu.memory_space<vmem>>, vector<1x128xf32>
    %14 = vector.broadcast %13 : vector<1x128xf32> to vector<8x128xf32>
    %15 = arith.addf %12, %14 : vector<8x128xf32>
    %cst_11 = arith.constant 5.000000e-02 : f32
    %16 = vector.broadcast %cst_11 : f32 to vector<8x128xf32>
    %17 = arith.mulf %16, %15 : vector<8x128xf32>
    %18 = arith.maximumf %15, %17 : vector<8x128xf32>
    %19 = arith.truncf %18 : vector<8x128xf32> to vector<8x128xbf16>
    %c0_12 = arith.constant 0 : index
    %c0_13 = arith.constant 0 : index
    %20 = vector.load %arg6[%c0_12, %c0_13] : memref<128x128xbf16, #tpu.memory_space<vmem>>, vector<128x128xbf16>
    %cst_14 = arith.constant dense<0.000000e+00> : vector<8x128xf32>
    %21 = tpu.matmul %19, %20, %cst_14 {dimension_numbers = #tpu.dot_dimension_numbers<[1], [0], [0], [1], [0, 0, 1, 1], [], []>} : vector<8x128xbf16>, vector<128x128xbf16>, vector<8x128xf32> -> vector<8x128xf32>
    %c0_15 = arith.constant 0 : index
    %c0_16 = arith.constant 0 : index
    %22 = vector.load %arg7[%c0_15, %c0_16] : memref<1x128xf32, #tpu.memory_space<vmem>>, vector<1x128xf32>
    %23 = vector.broadcast %22 : vector<1x128xf32> to vector<8x128xf32>
    %24 = arith.addf %21, %23 : vector<8x128xf32>
    %25 = tpu.iota {dimensions = array<i32: 1>} : vector<8x128xi32>
    %c4_i32 = arith.constant 4 : i32
    %26 = vector.broadcast %c4_i32 : i32 to vector<8x128xi32>
    %27 = arith.cmpi slt, %25, %26 : vector<8x128xi32>
    %cst_17 = arith.constant -1.000000e+30 : f32
    %28 = vector.broadcast %cst_17 : f32 to vector<8x128xf32>
    %29 = arith.select %27, %24, %28 : vector<8x128xi1>, vector<8x128xf32>
    %cst_18 = arith.constant dense<0xFF800000> : vector<8xf32>
    %30 = vector.multi_reduction <maximumf>, %29, %cst_18 [1] : vector<8x128xf32> to vector<8xf32>
    %31 = vector.shape_cast %30 : vector<8xf32> to vector<8x1xf32>
    %32 = vector.broadcast %31 : vector<8x1xf32> to vector<8x128xf32>
    %33 = arith.subf %29, %32 : vector<8x128xf32>
    %34 = math.exp %33 : vector<8x128xf32>
    %cst_19 = arith.constant dense<0.000000e+00> : vector<8xf32>
    %35 = vector.multi_reduction <add>, %34, %cst_19 [1] : vector<8x128xf32> to vector<8xf32>
    %36 = vector.shape_cast %35 : vector<8xf32> to vector<8x1xf32>
    %37 = tpu.reciprocal %36 {approx = true} : vector<8x1xf32> -> vector<8x1xf32>
    %38 = arith.mulf %36, %37 : vector<8x1xf32>
    %cst_20 = arith.constant 2.000000e+00 : f32
    %39 = vector.broadcast %cst_20 : f32 to vector<8x1xf32>
    %40 = arith.subf %39, %38 : vector<8x1xf32>
    %41 = arith.mulf %37, %40 : vector<8x1xf32>
    %42 = vector.extract_strided_slice %34 {offsets = [0, 0], sizes = [8, 8], strides = [1, 1]} : vector<8x128xf32> to vector<8x8xf32>
    %43 = vector.broadcast %41 : vector<8x1xf32> to vector<8x8xf32>
    %44 = arith.mulf %42, %43 : vector<8x8xf32>
    %c0_21 = arith.constant 0 : index
    %c0_22 = arith.constant 0 : index
    %45 = vector.load %arg8[%c0_21, %c0_22] : memref<8x8xf32, #tpu.memory_space<vmem>>, vector<8x8xf32>
    tpu.vector_store %arg8[%c0_21, %c0_22], %44 {strides = array<i32>} : memref<8x8xf32, #tpu.memory_space<vmem>>, vector<8x8xf32>,
    return
  }
  func.func @transform_0(%arg0: i32) -> (i32, i32) {
    %c0_i32 = arith.constant 0 : i32
    %c0_i32_0 = arith.constant 0 : i32
    return %arg0, %c0_i32 : i32, i32
  }
  func.func @transform_1(%arg0: i32) -> (i32, i32) {
    %c0_i32 = arith.constant 0 : i32
    %c0_i32_0 = arith.constant 0 : i32
    %c0_i32_1 = arith.constant 0 : i32
    return %c0_i32, %c0_i32_0 : i32, i32
  }
  func.func @transform_2(%arg0: i32) -> (i32, i32) {
    %c0_i32 = arith.constant 0 : i32
    %c0_i32_0 = arith.constant 0 : i32
    %c0_i32_1 = arith.constant 0 : i32
    return %c0_i32, %c0_i32_0 : i32, i32
  }
  func.func @transform_3(%arg0: i32) -> (i32, i32) {
    %c0_i32 = arith.constant 0 : i32
    %c0_i32_0 = arith.constant 0 : i32
    %c0_i32_1 = arith.constant 0 : i32
    return %c0_i32, %c0_i32_0 : i32, i32
  }
  func.func @transform_4(%arg0: i32) -> (i32, i32) {
    %c0_i32 = arith.constant 0 : i32
    %c0_i32_0 = arith.constant 0 : i32
    %c0_i32_1 = arith.constant 0 : i32
    return %c0_i32, %c0_i32_0 : i32, i32
  }
  func.func @transform_5(%arg0: i32) -> (i32, i32) {
    %c0_i32 = arith.constant 0 : i32
    %c0_i32_0 = arith.constant 0 : i32
    %c0_i32_1 = arith.constant 0 : i32
    return %c0_i32, %c0_i32_0 : i32, i32
  }
  func.func @transform_6(%arg0: i32) -> (i32, i32) {
    %c0_i32 = arith.constant 0 : i32
    %c0_i32_0 = arith.constant 0 : i32
    %c0_i32_1 = arith.constant 0 : i32
    return %c0_i32, %c0_i32_0 : i32, i32
  }
  func.func @transform_7(%arg0: i32) -> (i32, i32) {
    %c0_i32 = arith.constant 0 : i32
    %c0_i32_0 = arith.constant 0 : i32
    return %arg0, %c0_i32 : i32, i32
  }
}

</mosaic_0001>

<bundles_post_ra>
// kernel: diayn_forward.1
= control target key start
LH: loop header
LB: loop body
LE: loop exit
PB: predicated region body
PF: predicated region fallthrough
CT: control target
= control target key end

     0   :  { %12 = vsyncpa [#allocation3], 0  ;;  %s685_s0 = inlined_call_operand.hbm [shape: f32[8,8], index: 0, kind: input, shape index: {}]   ;;  %s686_s1 = inlined_call_operand.hbm [shape: bf16[8,128], index: 1, kind: input, shape index: {}]   ;;  %s687_s2 = inlined_call_operand.vmem [shape: f32[1,128], index: 2, kind: input, shape index: {}]   ;;  %s688_s3 = inlined_call_operand.hbm [shape: bf16[128,128], index: 3, kind: input, shape index: {}]   ;;  %s689_s4 = inlined_call_operand.vmem [shape: f32[1,128], index: 4, kind: input, shape index: {}]   ;;  %s690_s5 = inlined_call_operand.hbm [shape: bf16[128,128], index: 5, kind: input, shape index: {}]   ;;  %s691_s6 = inlined_call_operand.vmem [shape: f32[1,128], index: 6, kind: input, shape index: {}]   ;;  %s692_s7 = inlined_call_operand.vmem [shape: f32[8,8], index: 7, kind: output, shape index: {}]  }
   0x1   :  { %13 = vsyncpa [#allocation5], 0 }
   0x2   :  { %14 = vsyncpa [#allocation8], 0  ;;  %s588_s24 = smov [#allocation4]   ;;  %s589_s26 = smov [#allocation2]  }
   0x3   :  { %s31_s25 = sshll.u32 %s588_s24, 4  ;;  %s21_s27 = sshll.u32 %s589_s26, 4  ;;  %s32_s25 = int_to_ptr.vmem [resolvable:$true] %s31_s25  ;;  %s22_s27 = int_to_ptr.vmem [resolvable:$true] %s21_s27 }
   0x4   :  { %s510_s28 = scalar_lea.vmem %s32_s25, 64  ;;  %p515_p1 = scmp.lt.s32.totalorder %s32_s25, %s32_s25 }
   0x5   :  { %p511_p0 = scmp.ne.s32.totalorder %s32_s25, %s510_s28  ;;  %p516_p2 = scmp.lt.s32.totalorder %s510_s28, %s510_s28 }
   0x7   :  { %p517_p3 = por %p516_p2, %p515_p1 }
   0x9   :  { %p518_p4 = pnand %p517_p3, %p511_p0 }
   0xb   :  { %521 = shalt.err (!%p518_p4)
}
   0xc   :  { %34 = dma.hbm_to_vmem [thread:$0]  %s686_s1, 64, %s32_s25, [#allocation5]  }
   0xd   :  { %s530_s8 = scalar_lea.vmem %s22_s27, 128  ;;  %p535_p6 = scmp.lt.s32.totalorder %s22_s27, %s22_s27 }
   0xe   :  { %p531_p5 = scmp.ne.s32.totalorder %s22_s27, %s530_s8  ;;  %p536_p7 = scmp.lt.s32.totalorder %s530_s8, %s530_s8 }
  0x10   :  { %p537_p8 = por %p536_p7, %p535_p6 }
  0x12   :  { %p538_p9 = pnand %p537_p8, %p531_p5 }
  0x14   :  { %541 = shalt.err (!%p538_p9)
}
  0x15   :  { %24 = dma.hbm_to_vmem [thread:$0]  %s685_s0, 128, %s22_s27, [#allocation3]  }
  0x16   :  { %s590_s11 = smov [#allocation6]  }
  0x17   :  { %s42_s12 = sshll.u32 %s590_s11, 4  ;;  %s43_s12 = int_to_ptr.vmem [resolvable:$true] %s42_s12 }
  0x18   :  { %s550_s13 = scalar_lea.vmem %s43_s12, 1024  ;;  %p555_p11 = scmp.lt.s32.totalorder %s43_s12, %s43_s12 }
  0x19   :  { %p551_p10 = scmp.ne.s32.totalorder %s43_s12, %s550_s13  ;;  %p556_p12 = scmp.lt.s32.totalorder %s550_s13, %s550_s13 }
  0x1b   :  { %p557_p13 = por %p556_p12, %p555_p11 }
  0x1d   :  { %p558_p0 = pnand %p557_p13, %p551_p10 }
  0x1f   :  { %561 = shalt.err (!%p558_p0)
}
  0x20   :  { %s591_s1 = smov 64   ;;  %s592_s14 = smov 4  }
  0x21   :  { %48 = dma.hbm_to_vmem [thread:$0]  %s688_s3, 1024, %s43_s12, [#allocation5], %s591_s1, %s591_s1, %s592_s14  }
  0x22   :  { %s593_s17 = smov [#allocation7]  }
  0x23   :  { %s56_s18 = sshll.u32 %s593_s17, 4  ;;  %s57_s18 = int_to_ptr.vmem [resolvable:$true] %s56_s18 }
  0x24   :  { %s570_s0 = scalar_lea.vmem %s57_s18, 1024  ;;  %p575_p2 = scmp.lt.s32.totalorder %s57_s18, %s57_s18 }
  0x25   :  { %p571_p1 = scmp.ne.s32.totalorder %s57_s18, %s570_s0  ;;  %p576_p3 = scmp.lt.s32.totalorder %s570_s0, %s570_s0 }
  0x27   :  { %p577_p4 = por %p576_p3, %p575_p2 }
  0x29   :  { %p578_p5 = pnand %p577_p4, %p571_p1 }
  0x2b   :  { %581 = shalt.err (!%p578_p5)
}
  0x2c   :  { %62 = dma.hbm_to_vmem [thread:$0]  %s690_s5, 1024, %s57_s18, [#allocation8], %s591_s1, %s591_s1, %s592_s14  }
  0x2d   :  { %582 = dma.done.wait [#allocation3], 128  }
  0x2e   :  { %583 = vsyncadd [#allocation3], 4294967168 }
  0x2f   :  { %584 = dma.done.wait [#allocation5], 1088  }
  0x30   :  { %585 = vsyncadd [#allocation5], 4294966208 }
  0x31   :  { %586 = dma.done.wait [#allocation8], 1024  }
  0x32   :  { %587 = vsyncadd [#allocation8], 4294966272  ;;  %v594_v0 = vmov 0.0   ;;  %vm595_vm0 = vmmov 0   ;;  %vm92_vm1 = vcmask 1043456   ;;  %v78_v2 = vld [vmem:[#allocation2] sm:$0xff]  ;;  %v364_v39 = vlaneseq }
  0x33   :  { %428 = vmatprep.subr.bf16.mxu0 %v594_v0  ;;  %430 = vmatprep.mubr.msk.bf16.mxu0 %vm595_vm0, %v594_v0  ;;  %v80_v1 = vld [vmem:[#allocation4] sm:$0xf]  ;;  %v79_v4 = vpack.c.bf16 %v78_v2, %v78_v2  ;;  %vm88_vm2 = vcmask 64512   ;;  %v483_v6 = vld [vmem:[#allocation6 + $0x30] sm:$0xff]   ;;  %v484_v7 = vld [vmem:[#allocation6 + $0x28] sm:$0xff]  }
  0x34   :  { %434 = vmatprep.subr.bf16.mxu1 %v594_v0  ;;  %450 = vmatprep.mubr.msk.bf16.mxu1 %vm595_vm0, %v594_v0  ;;  %v94_v3 = vsel %vm92_vm1, %v80_v1, 0  ;;  %v482_v5 = vld [vmem:[#allocation6 + $0x38] sm:$0xff]   ;;  %v485_v8 = vld [vmem:[#allocation6 + $0x20] sm:$0xff]   ;;  %v487_v10 = vld [vmem:[#allocation6 + $0x10] sm:$0xff]   ;;  %v365_v40 = vand.u32 127, %v364_v39 }
  0x35   :  { %429 = vmatpush3.bf16.msra.mxu0 %v94_v3  ;;  %435 = vmatpush3.bf16.msra.mxu1 %v482_v5  ;;  %v486_v9 = vld [vmem:[#allocation6 + $0x18] sm:$0xff]   ;;  %v488_v11 = vld [vmem:[#allocation6 + $0x8] sm:$0xff]   ;;  %v489_v12 = vld [vmem:[#allocation6] sm:$0xff]  }
  0x36   :  { %454 = vmatprep.subr.bf16.mxu0 %v594_v0  ;;  %436 = vmatprep.subr.bf16.mxu1 %v594_v0  ;;  %v490_v13 = vld [vmem:[#allocation7 + $0x38] sm:$0xff]   ;;  %v491_v14 = vld [vmem:[#allocation7 + $0x30] sm:$0xff]   ;;  %v492_v15 = vld [vmem:[#allocation7 + $0x28] sm:$0xff]   ;;  %vm366_vm3 = vcmp.lt.s32.totalorder %v365_v40, 4 }
  0x37   :  { %v493_v16 = vld [vmem:[#allocation7 + $0x20] sm:$0xff]   ;;  %v494_v17 = vld [vmem:[#allocation7 + $0x18] sm:$0xff]   ;;  %v495_v18 = vld [vmem:[#allocation7 + $0x10] sm:$0xff]  }
  0x38   :  { %431 = vmatmul.mubr.msk.bf16.vlgmr.msra.gmra.mxu0 %vm88_vm2, %v79_v4  ;;  %v388_v19 = vld [vmem:[%s687_s2] ss:$0 sm:$0xff]  ;;  %v496_v28 = vld [vmem:[#allocation7 + $0x8] sm:$0xff]   ;;  %v497_v29 = vld [vmem:[#allocation7] sm:$0xff]  }
  0x39   :  { %470 = vmatprep.mubr.msk.bf16.mxu0 %vm595_vm0, %v594_v0  ;;  %437 = vmatpush3.bf16.msra.mxu1 %v483_v6  ;;  %v390_v30 = vld [vmem:[%s689_s4] ss:$0 sm:$0xff] }
  0x3a   :  { %438 = vmatprep.subr.bf16.mxu1 %v594_v0  ;;  %455 = vmatpush3.bf16.msra.mxu0 %v490_v13  ;;  %v399_v41 = vld [vmem:[%s691_s6] ss:$0 sm:$0xff] }
  0x3b   :  { %456 = vmatprep.subr.bf16.mxu0 %v594_v0 }
  0x3d   :  { %439 = vmatpush3.bf16.msra.mxu1 %v484_v7 }
  0x3e   :  { %440 = vmatprep.subr.bf16.mxu1 %v594_v0  ;;  %457 = vmatpush3.bf16.msra.mxu0 %v491_v14 }
  0x3f   :  { %458 = vmatprep.subr.bf16.mxu0 %v594_v0 }
  0x41   :  { %441 = vmatpush3.bf16.msra.mxu1 %v485_v8 }
  0x42   :  { %442 = vmatprep.subr.bf16.mxu1 %v594_v0  ;;  %459 = vmatpush3.bf16.msra.mxu0 %v492_v15 }
  0x43   :  { %460 = vmatprep.subr.bf16.mxu0 %v594_v0 }
  0x45   :  { %443 = vmatpush3.bf16.msra.mxu1 %v486_v9 }
  0x46   :  { %444 = vmatprep.subr.bf16.mxu1 %v594_v0  ;;  %461 = vmatpush3.bf16.msra.mxu0 %v493_v16 }
  0x47   :  { %462 = vmatprep.subr.bf16.mxu0 %v594_v0 }
  0x49   :  { %445 = vmatpush3.bf16.msra.mxu1 %v487_v10 }
  0x4a   :  { %446 = vmatprep.subr.bf16.mxu1 %v594_v0  ;;  %463 = vmatpush3.bf16.msra.mxu0 %v494_v17 }
  0x4b   :  { %464 = vmatprep.subr.bf16.mxu0 %v594_v0 }
  0x4d   :  { %447 = vmatpush3.bf16.msra.mxu1 %v488_v11 }
  0x4e   :  { %448 = vmatprep.subr.bf16.mxu1 %v594_v0  ;;  %465 = vmatpush3.bf16.msra.mxu0 %v495_v18 }
  0x4f   :  { %466 = vmatprep.subr.bf16.mxu0 %v594_v0 }
  0x51   :  { %449 = vmatpush3.bf16.msra.mxu1 %v489_v12 }
  0x52   :  { %467 = vmatpush3.bf16.msra.mxu0 %v496_v28 }
  0x53   :  { %468 = vmatprep.subr.bf16.mxu0 %v594_v0 }
  0x56   :  { %469 = vmatpush3.bf16.msra.mxu0 %v497_v29 }
  0xf8   :  { %v130_v20 = vpop.f32.mrf.mxu0 }
  0xf9   :  { %v131_v21 = vadd.f32 %v388_v19, %v130_v20 }
  0xfa   :  { %v432_v22 = vpop.f32.mrf.mxu0 }
  0xfb   :  { %v136_v23 = vmul.f32 0.05, %v131_v21 }
  0xfc   :  { %v133_v24 = vpop.f32.mrf.mxu0 }
  0xfd   :  { %v137_v25 = vmax.f32 %v131_v21, %v136_v23 }
  0xfe   :  { %v433_v26 = vpop.f32.mrf.mxu0 }
  0xff   :  { %v138_v27 = vpack.c.bf16 %v137_v25, %v137_v25 }
 0x101   :  { %451 = vmatmul.mubr.bf16.vlgmr.msra.gmra.mxu1 %v138_v27 }
 0x1c1   :  { %v244_v31 = vpop.f32.mrf.mxu1 }
 0x1c2   :  { %v245_v32 = vadd.f32 %v390_v30, %v244_v31 }
 0x1c3   :  { %v452_v33 = vpop.f32.mrf.mxu1 }
 0x1c4   :  { %v250_v34 = vmul.f32 0.05, %v245_v32 }
 0x1c5   :  { %v247_v35 = vpop.f32.mrf.mxu1 }
 0x1c6   :  { %v251_v36 = vmax.f32 %v245_v32, %v250_v34 }
 0x1c7   :  { %v453_v37 = vpop.f32.mrf.mxu1 }
 0x1c8   :  { %v252_v38 = vpack.c.bf16 %v251_v36, %v251_v36 }
 0x1ca   :  { %471 = vmatmul.mubr.bf16.vlgmr.msra.gmra.mxu0 %v252_v38 }
 0x28a   :  { %v358_v42 = vpop.f32.mrf.mxu0 }
 0x28b   :  { %v359_v43 = vadd.f32 %v399_v41, %v358_v42 }
 0x28c   :  { %v472_v44 = vpop.f32.mrf.mxu0 }
 0x28d   :  { %v367_v45 = vsel %vm366_vm3, %v359_v43, -1e+30 }
 0x28e   :  { %368 = vmax.xlane.f32.xlu0 %v367_v45  ;;  %v361_v46 = vpop.f32.mrf.mxu0 }
 0x290   :  { %v473_v47 = vpop.f32.mrf.mxu0 }
 0x317   :  { %v369_v48 = vpop.xlane.xlu0 %368 }
 0x318   :  { %v370_v49 = vsub.f32 %v367_v45, %v369_v48 }
 0x31a   :  { %v371_v50 = vmul.f32 1.442695, %v370_v49 }
 0x31c   :  { %498 = vpow2.f32 %v371_v50 }
 0x329   :  { %v499_v51 = vpop.eup %498 }
 0x32a   :  { %373 = vadd.xlane.f32.xlu0 %v499_v51 }
 0x3b3   :  { %v374_v52 = vpop.xlane.xlu0 %373 }
 0x3b4   :  { %500 = vrcp.f32 %v374_v52 }
 0x3c1   :  { %v501_v53 = vpop.eup %500 }
 0x3c2   :  { %v376_v54 = vmul.f32 %v501_v53, %v374_v52 }
 0x3c4   :  { %v377_v55 = vsub.f32 2.0, %v376_v54 }
 0x3c6   :  { %v378_v56 = vmul.f32 %v501_v53, %v377_v55 }
 0x3c8   :  { %v379_v57 = vmul.f32 %v499_v51, %v378_v56 }
 0x3ca   :  { %380 = vst.msk [vmem:[%s692_s7] sm:$0xff] %vm88_vm2, %v379_v57 }
 0x3cb   :  { %385 = vsyncpa [#allocation3], 1 }
 0x3cc   :  { %386 = vsyncpa [#allocation5], 1 }
 0x3cd   :  { %387 = vsyncpa [#allocation8], 1 }

</bundles_post_ra>
